<compile_context>
chip_gen: v7x
topology: tpu7x:2x2x1
jax: 0.10.0
libtpu: 0.0.40
codegen_flags: <defaults>
</compile_context>

<pallas_src>
import jax
import jax.numpy as jnp
from jax.experimental import pallas as pl
from jax.experimental.pallas import tpu as pltpu


def decoder_kernel(x_ref, w1_ref, b1_ref, w2_ref, b2_ref, o_ref):
    x = x_ref[...]                       # (TB, 3)    f32
    w1 = w1_ref[...]                     # (3, HIDp)  f32
    # First layer: depth-3 contraction as VPU broadcast-FMAs (no MXU pass).
    h = x[:, 0:1] * w1[0:1, :]
    for k in range(1, x.shape[1]):
        h = h + x[:, k:k + 1] * w1[k:k + 1, :]
    h = jnp.maximum(h + b1_ref[...], 0.0)            # ReLU; Dropout = identity (eval)
    # Second layer on the MXU: bf16 inputs, f32 accumulation, true 900 width.
    z = jnp.dot(h.astype(w2_ref.dtype), w2_ref[...],
                preferred_element_type=jnp.float32) + b2_ref[...]   # (TB, 900)
    # sigmoid(z) == 0.5*tanh(0.5*z) + 0.5 : single transcendental per element.
    o_ref[...] = (0.5 * jnp.tanh(0.5 * z) + 0.5).astype(o_ref.dtype)


def _round_up(n, m):
    return (n + m - 1) // m * m


def prepare_decoder_params(w1, b1, w2, b2):
    """One-time layout prep (hoisted out of the per-call path).

    Pads hidden dim 100 -> 128 (lane-dense), stores w2 in bf16 for the MXU.
    """
    in_dim, hid = w1.shape
    out_dim = w2.shape[1]
    hid_p = _round_up(hid, 128)          # 100 -> 128

    w1_p = jnp.zeros((in_dim, hid_p), jnp.float32).at[:, :hid].set(
        w1.astype(jnp.float32))
    b1_p = jnp.zeros((1, hid_p), jnp.float32).at[:, :hid].set(
        jnp.asarray(b1, jnp.float32).reshape(1, hid))
    w2_p = jnp.zeros((hid_p, out_dim), jnp.bfloat16).at[:hid, :].set(
        w2.astype(jnp.bfloat16))
    b2_p = jnp.asarray(b2, jnp.float32).reshape(1, out_dim)
    return w1_p, b1_p, w2_p, b2_p


def trans_lstm_decoder(x, params, *, max_block_b=512):
    """x: (B, 3) f32; params from prepare_decoder_params.

    Returns (B, 900) f32 == Sigmoid(ReLU(x @ w1 + b1) @ w2 + b2).
    """
    w1_p, b1_p, w2_p, b2_p = params
    B, in_dim = x.shape
    hid_p = w1_p.shape[1]
    out_dim = w2_p.shape[1]

    # Batch tiling: pad only to the sublane multiple actually needed; use >= 2
    # grid steps when possible so v7x's 2 TensorCores both get work.
    b8 = _round_up(max(B, 8), 8)
    if b8 <= 8:
        n_tiles = 1
    elif b8 <= max_block_b:
        n_tiles = 2
    else:
        n_tiles = pl.cdiv(b8, max_block_b)
    tb = _round_up(pl.cdiv(b8, n_tiles), 8)
    b_pad = n_tiles * tb

    x_p = x if b_pad == B else jnp.zeros((b_pad, in_dim), x.dtype).at[:B].set(x)

    out = pl.pallas_call(
        decoder_kernel,
        out_shape=jax.ShapeDtypeStruct((b_pad, out_dim), jnp.float32),
        grid=(n_tiles,),
        in_specs=[
            pl.BlockSpec((tb, in_dim), lambda i: (i, 0)),        # x tile
            pl.BlockSpec((in_dim, hid_p), lambda i: (0, 0)),     # w1 (resident)
            pl.BlockSpec((1, hid_p), lambda i: (0, 0)),          # b1 (resident)
            pl.BlockSpec((hid_p, out_dim), lambda i: (0, 0)),    # w2 (resident)
            pl.BlockSpec((1, out_dim), lambda i: (0, 0)),        # b2 (resident)
        ],
        out_specs=pl.BlockSpec((tb, out_dim), lambda i: (i, 0)),
        compiler_params=pltpu.CompilerParams(
            dimension_semantics=("parallel",),
            vmem_limit_bytes=16 << 20,
        ),
    )(x_p, w1_p, b1_p, w2_p, b2_p)

    # No column slice (true 900 width in-kernel); row slice only if B was padded.
    return out if b_pad == B else out[:B]


def init_params(key, input_size_ae=900):
    """Deterministic init mimicking PyTorch nn.Linear (uniform +/- 1/sqrt(fan_in))."""
    k1, k2, k3, k4 = jax.random.split(key, 4)
    lim1 = 1.0 / jnp.sqrt(3.0)
    lim2 = 1.0 / jnp.sqrt(100.0)
    w1 = jax.random.uniform(k1, (3, 100), jnp.float32, -lim1, lim1)
    b1 = jax.random.uniform(k2, (1, 100), jnp.float32, -lim1, lim1)
    w2 = jax.random.uniform(k3, (100, input_size_ae), jnp.float32, -lim2, lim2)
    b2 = jax.random.uniform(k4, (1, input_size_ae), jnp.float32, -lim2, lim2)
    return w1, b1, w2, b2


if __name__ == "__main__":
    key = jax.random.PRNGKey(0)
    k_in, k_par = jax.random.split(key)

    input_size_ae = 900
    w1, b1, w2, b2 = init_params(k_par, input_size_ae)
    # Weight layout prep is done ONCE, outside the per-call hot path.
    params = jax.tree.map(jax.block_until_ready,
                          prepare_decoder_params(w1, b1, w2, b2))

    # batch=2 exercises the single-tile + row-padding path; batch=260
    # exercises the 2-tile grid with minimal (12-row) batch padding.
    for batch in (2, 260):
        kx = jax.random.fold_in(k_in, batch)
        x = jax.random.normal(kx, (batch, 3), jnp.float32)

        out = jax.block_until_ready(trans_lstm_decoder(x, params))
        assert out.shape == (batch, input_size_ae)

        # Exact PyTorch (eval-mode) semantics in f32 — loose tolerance covers
        # the intentional bf16 storage of w2.
        h_ref = jnp.maximum(x @ w1 + b1, 0.0)
        ref_f32 = jax.nn.sigmoid(h_ref @ w2 + b2)
        assert jnp.allclose(out, ref_f32, atol=2e-2, rtol=0.0), float(
            jnp.max(jnp.abs(out - ref_f32)))

        # Tight check against a reference using the same bf16-w2 numerics.
        ref_bf16 = jax.nn.sigmoid(
            jnp.dot(h_ref.astype(jnp.bfloat16), w2.astype(jnp.bfloat16),
                    preferred_element_type=jnp.float32) + b2)
        assert jnp.allclose(out, ref_bf16, atol=5e-3, rtol=0.0), float(
            jnp.max(jnp.abs(out - ref_bf16)))

    print("KERNEL_OK")
</pallas_src>

<mosaic_0001>
module attributes {stable_mosaic.version = 11 : i64} {
  func.func @decoder_kernel(%arg0: i32, %arg1: memref<8x3xf32, #tpu.memory_space<vmem>>, %arg2: memref<3x128xf32, #tpu.memory_space<vmem>>, %arg3: memref<1x128xf32, #tpu.memory_space<vmem>>, %arg4: memref<128x900xbf16, #tpu.memory_space<vmem>>, %arg5: memref<1x900xf32, #tpu.memory_space<vmem>>, %arg6: memref<8x900xf32, #tpu.memory_space<vmem>>) attributes {dimension_semantics = [#tpu.dimension_semantics<parallel>], iteration_bounds = array<i64: 1>, scalar_prefetch = 0 : i64, scratch_operands = 0 : i64, tpu.core_type = #tpu.core_type<tc>, window_params = [{transform_indices = @transform_0, window_bounds = array<i64: 8, 3>}, {pipeline_mode = #tpu.pipeline_mode<synchronous>, transform_indices = @transform_1, window_bounds = array<i64: 3, 128>}, {pipeline_mode = #tpu.pipeline_mode<synchronous>, transform_indices = @transform_2, window_bounds = array<i64: 1, 128>}, {pipeline_mode = #tpu.pipeline_mode<synchronous>, transform_indices = @transform_3, window_bounds = array<i64: 128, 900>}, {pipeline_mode = #tpu.pipeline_mode<synchronous>, transform_indices = @transform_4, window_bounds = array<i64: 1, 900>}, {transform_indices = @transform_5, window_bounds = array<i64: 8, 900>}]} {
    %c0 = arith.constant 0 : index
    %c0_0 = arith.constant 0 : index
    %0 = vector.load %arg1[%c0, %c0_0] : memref<8x3xf32, #tpu.memory_space<vmem>>, vector<8x3xf32>
    %c0_1 = arith.constant 0 : index
    %c0_2 = arith.constant 0 : index
    %1 = vector.load %arg2[%c0_1, %c0_2] : memref<3x128xf32, #tpu.memory_space<vmem>>, vector<3x128xf32>
    %2 = vector.extract_strided_slice %0 {offsets = [0, 0], sizes = [8, 1], strides = [1, 1]} : vector<8x3xf32> to vector<8x1xf32>
    %3 = vector.extract_strided_slice %1 {offsets = [0, 0], sizes = [1, 128], strides = [1, 1]} : vector<3x128xf32> to vector<1x128xf32>
    %4 = vector.broadcast %2 : vector<8x1xf32> to vector<8x128xf32>
    %5 = vector.broadcast %3 : vector<1x128xf32> to vector<8x128xf32>
    %6 = arith.mulf %4, %5 : vector<8x128xf32>
    %7 = vector.extract_strided_slice %0 {offsets = [0, 1], sizes = [8, 1], strides = [1, 1]} : vector<8x3xf32> to vector<8x1xf32>
    %8 = vector.extract_strided_slice %1 {offsets = [1, 0], sizes = [1, 128], strides = [1, 1]} : vector<3x128xf32> to vector<1x128xf32>
    %9 = vector.broadcast %7 : vector<8x1xf32> to vector<8x128xf32>
    %10 = vector.broadcast %8 : vector<1x128xf32> to vector<8x128xf32>
    %11 = arith.mulf %9, %10 : vector<8x128xf32>
    %12 = arith.addf %6, %11 : vector<8x128xf32>
    %13 = vector.extract_strided_slice %0 {offsets = [0, 2], sizes = [8, 1], strides = [1, 1]} : vector<8x3xf32> to vector<8x1xf32>
    %14 = vector.extract_strided_slice %1 {offsets = [2, 0], sizes = [1, 128], strides = [1, 1]} : vector<3x128xf32> to vector<1x128xf32>
    %15 = vector.broadcast %13 : vector<8x1xf32> to vector<8x128xf32>
    %16 = vector.broadcast %14 : vector<1x128xf32> to vector<8x128xf32>
    %17 = arith.mulf %15, %16 : vector<8x128xf32>
    %18 = arith.addf %12, %17 : vector<8x128xf32>
    %c0_3 = arith.constant 0 : index
    %c0_4 = arith.constant 0 : index
    %19 = vector.load %arg3[%c0_3, %c0_4] : memref<1x128xf32, #tpu.memory_space<vmem>>, vector<1x128xf32>
    %20 = vector.broadcast %19 : vector<1x128xf32> to vector<8x128xf32>
    %21 = arith.addf %18, %20 : vector<8x128xf32>
    %cst = arith.constant 0.000000e+00 : f32
    %22 = vector.broadcast %cst : f32 to vector<8x128xf32>
    %23 = arith.maximumf %21, %22 : vector<8x128xf32>
    %24 = arith.truncf %23 : vector<8x128xf32> to vector<8x128xbf16>
    %c0_5 = arith.constant 0 : index
    %c0_6 = arith.constant 0 : index
    %25 = vector.load %arg4[%c0_5, %c0_6] : memref<128x900xbf16, #tpu.memory_space<vmem>>, vector<128x900xbf16>
    %cst_7 = arith.constant dense<0.000000e+00> : vector<8x900xf32>
    %26 = tpu.matmul %24, %25, %cst_7 {dimension_numbers = #tpu.dot_dimension_numbers<[1], [0], [0], [1], [0, 0, 1, 1], [], []>} : vector<8x128xbf16>, vector<128x900xbf16>, vector<8x900xf32> -> vector<8x900xf32>
    %c0_8 = arith.constant 0 : index
    %c0_9 = arith.constant 0 : index
    %27 = vector.load %arg5[%c0_8, %c0_9] : memref<1x900xf32, #tpu.memory_space<vmem>>, vector<1x900xf32>
    %28 = vector.broadcast %27 : vector<1x900xf32> to vector<8x900xf32>
    %29 = arith.addf %26, %28 : vector<8x900xf32>
    %cst_10 = arith.constant 5.000000e-01 : f32
    %30 = vector.broadcast %cst_10 : f32 to vector<8x900xf32>
    %31 = arith.mulf %30, %29 : vector<8x900xf32>
    %32 = math.tanh %31 : vector<8x900xf32>
    %cst_11 = arith.constant 5.000000e-01 : f32
    %33 = vector.broadcast %cst_11 : f32 to vector<8x900xf32>
    %34 = arith.mulf %33, %32 : vector<8x900xf32>
    %cst_12 = arith.constant 5.000000e-01 : f32
    %35 = vector.broadcast %cst_12 : f32 to vector<8x900xf32>
    %36 = arith.addf %34, %35 : vector<8x900xf32>
    %c0_13 = arith.constant 0 : index
    %c0_14 = arith.constant 0 : index
    %37 = vector.load %arg6[%c0_13, %c0_14] : memref<8x900xf32, #tpu.memory_space<vmem>>, vector<8x900xf32>
    tpu.vector_store %arg6[%c0_13, %c0_14], %36 {strides = array<i32>} : memref<8x900xf32, #tpu.memory_space<vmem>>, vector<8x900xf32>,
    return
  }
  func.func @transform_0(%arg0: i32) -> (i32, i32) {
    %c0_i32 = arith.constant 0 : i32
    %c0_i32_0 = arith.constant 0 : i32
    return %arg0, %c0_i32 : i32, i32
  }
  func.func @transform_1(%arg0: i32) -> (i32, i32) {
    %c0_i32 = arith.constant 0 : i32
    %c0_i32_0 = arith.constant 0 : i32
    %c0_i32_1 = arith.constant 0 : i32
    return %c0_i32, %c0_i32_0 : i32, i32
  }
  func.func @transform_2(%arg0: i32) -> (i32, i32) {
    %c0_i32 = arith.constant 0 : i32
    %c0_i32_0 = arith.constant 0 : i32
    %c0_i32_1 = arith.constant 0 : i32
    return %c0_i32, %c0_i32_0 : i32, i32
  }
  func.func @transform_3(%arg0: i32) -> (i32, i32) {
    %c0_i32 = arith.constant 0 : i32
    %c0_i32_0 = arith.constant 0 : i32
    %c0_i32_1 = arith.constant 0 : i32
    return %c0_i32, %c0_i32_0 : i32, i32
  }
  func.func @transform_4(%arg0: i32) -> (i32, i32) {
    %c0_i32 = arith.constant 0 : i32
    %c0_i32_0 = arith.constant 0 : i32
    %c0_i32_1 = arith.constant 0 : i32
    return %c0_i32, %c0_i32_0 : i32, i32
  }
  func.func @transform_5(%arg0: i32) -> (i32, i32) {
    %c0_i32 = arith.constant 0 : i32
    %c0_i32_0 = arith.constant 0 : i32
    return %arg0, %c0_i32 : i32, i32
  }
}

</mosaic_0001>

<bundles_post_ra>
// kernel: tpu_custom_call.1
= control target key start
LH: loop header
LB: loop body
LE: loop exit
PB: predicated region body
PF: predicated region fallthrough
CT: control target
= control target key end

     0   :  { %v822_v3 = vmov 0   ;;  %v823_v4 = vmov 2   ;;  %v824_v24 = vmov 1   ;;  %s1127_s0 = inlined_call_operand.vmem [shape: f32[8,3], index: 0, kind: input, shape index: {}]   ;;  %s1128_s1 = inlined_call_operand.vmem [shape: f32[3,128], index: 1, kind: input, shape index: {}]   ;;  %s1129_s2 = inlined_call_operand.vmem [shape: f32[1,128], index: 2, kind: input, shape index: {}]   ;;  %s1130_s3 = inlined_call_operand.vmem [shape: bf16[128,900], index: 3, kind: input, shape index: {}]   ;;  %s1131_s4 = inlined_call_operand.vmem [shape: f32[1,900], index: 4, kind: input, shape index: {}]   ;;  %s1132_s5 = inlined_call_operand.hbm [shape: f32[8,900], index: 5, kind: output, shape index: {}]  }
   0x1   :  { %v22_v0 = vld [vmem:[%s1127_s0] sm:$0xff]  ;;  %778 = vset.pattern.permute.xlu0 %v822_v3  ;;  %780 = vset.pattern.permute.xlu1 %v823_v4  ;;  %v65_v6 = vld [vmem:[%s1130_s3 + $0x8] sm:$0xff] }
   0x2   :  { %v64_v1 = vld [vmem:[%s1130_s3] sm:$0xff]  ;;  %v69_v7 = vld [vmem:[%s1130_s3 + $0x28] sm:$0xff]  ;;  %26 = vperm.xlu0 %778, %v22_v0   ;;  %45 = vperm.xlu1 %780, %v22_v0  }
   0x3   :  { %v68_v2 = vld [vmem:[%s1130_s3 + $0x20] sm:$0xff]  ;;  %v713_v10 = vcombine.high %v65_v6, %v69_v7  ;;  %v712_v11 = vcombine.low %v65_v6, %v69_v7  ;;  %v73_v13 = vld [vmem:[%s1130_s3 + $0x48] sm:$0xff]  ;;  %522 = vmatprep.mubr.bf16.mxu0 %v822_v3 }
   0x4   :  { %v711_v5 = vcombine.high %v64_v1, %v68_v2  ;;  %v710_v8 = vcombine.low %v64_v1, %v68_v2  ;;  %v72_v9 = vld [vmem:[%s1130_s3 + $0x40] sm:$0xff]  ;;  %v77_v14 = vld [vmem:[%s1130_s3 + $0x68] sm:$0xff] }
   0x5   :  { %v76_v12 = vld [vmem:[%s1130_s3 + $0x60] sm:$0xff]  ;;  %v721_v16 = vcombine.high %v73_v13, %v77_v14  ;;  %v81_v19 = vld [vmem:[%s1130_s3 + $0x88] sm:$0xff]  ;;  %531 = vmatprep.subr.bf16.mxu1 %v713_v10  ;;  %v720_v22 = vcombine.low %v73_v13, %v77_v14 }
   0x6   :  { %490 = vmatprep.subr.bf16.mxu0 %v711_v5  ;;  %v719_v15 = vcombine.high %v72_v9, %v76_v12  ;;  %v80_v17 = vld [vmem:[%s1130_s3 + $0x80] sm:$0xff]  ;;  %v718_v20 = vcombine.low %v72_v9, %v76_v12  ;;  %v85_v21 = vld [vmem:[%s1130_s3 + $0xa8] sm:$0xff]  ;;  %532 = vmatpush1.bf16.msra.mxu1 %v712_v11 }
   0x7   :  { %v84_v18 = vld [vmem:[%s1130_s3 + $0xa0] sm:$0xff]  ;;  %491 = vmatpush1.bf16.msra.mxu0 %v710_v8  ;;  %779 = vset.pattern.permute.xlu0 %v824_v24  ;;  %v729_v25 = vcombine.high %v81_v19, %v85_v21  ;;  %v89_v28 = vld [vmem:[%s1130_s3 + $0xc8] sm:$0xff]  ;;  %v728_v31 = vcombine.low %v81_v19, %v85_v21 }
   0x8   :  { %492 = vmatprep.subr.bf16.mxu0 %v719_v15  ;;  %v727_v23 = vcombine.high %v80_v17, %v84_v18  ;;  %533 = vmatprep.subr.bf16.mxu1 %v721_v16  ;;  %v88_v26 = vld [vmem:[%s1130_s3 + $0xc0] sm:$0xff]  ;;  %v93_v29 = vld [vmem:[%s1130_s3 + $0xe8] sm:$0xff]  ;;  %v726_v30 = vcombine.low %v80_v17, %v84_v18 }
   0x9   :  { %v92_v27 = vld [vmem:[%s1130_s3 + $0xe0] sm:$0xff]  ;;  %35 = vperm.xlu0 %779, %v22_v0   ;;  %v737_v33 = vcombine.high %v89_v28, %v93_v29 }
   0xa   :  { %534 = vmatpush1.bf16.msra.mxu1 %v720_v22  ;;  %v735_v32 = vcombine.high %v88_v26, %v92_v27  ;;  %v96_v34 = vld [vmem:[%s1130_s3 + $0x100] sm:$0xff] }
   0xb   :  { %493 = vmatpush1.bf16.msra.mxu0 %v718_v20  ;;  %535 = vmatprep.subr.bf16.mxu1 %v729_v25  ;;  %v100_v35 = vld [vmem:[%s1130_s3 + $0x120] sm:$0xff] }
   0xc   :  { %494 = vmatprep.subr.bf16.mxu0 %v727_v23 }
   0xd   :  { %10 = vsyncpa [#allocation3], 0  ;;  %v97_v36 = vld [vmem:[%s1130_s3 + $0x108] sm:$0xff]  ;;  %563 = vmatprep.mubr.bf16.mxu1 %v822_v3  ;;  %781 = vset.pattern.permute.xlu0 %v823_v4  ;;  %v734_v38 = vcombine.low %v88_v26, %v92_v27  ;;  %v736_v39 = vcombine.low %v89_v28, %v93_v29  ;;  %v743_v40 = vcombine.high %v96_v34, %v100_v35  ;;  %v104_v41 = vld [vmem:[%s1130_s3 + $0x140] sm:$0xff]  ;;  %v29_v13 = vlaneseq }
   0xe   :  { %v101_v37 = vld [vmem:[%s1130_s3 + $0x128] sm:$0xff]  ;;  %536 = vmatpush1.bf16.msra.mxu1 %v728_v31  ;;  %v108_v43 = vld [vmem:[%s1130_s3 + $0x160] sm:$0xff]  ;;  %v937_v46 = vld [vmem:[%s1130_s3 + $0x10] sm:$0xff]  ;;  %v742_v49 = vcombine.low %v96_v34, %v100_v35  ;;  %vm693_vm0 = vcmask 31744  }
   0xf   :  { %495 = vmatpush1.bf16.msra.mxu0 %v726_v30  ;;  %537 = vmatprep.subr.bf16.mxu1 %v737_v33  ;;  %v745_v42 = vcombine.high %v97_v36, %v101_v37  ;;  %v105_v44 = vld [vmem:[%s1130_s3 + $0x148] sm:$0xff]  ;;  %v942_v47 = vld [vmem:[%s1130_s3 + $0x30] sm:$0xff]  ;;  %v947_v48 = vld [vmem:[%s1130_s3 + $0x18] sm:$0xff]  ;;  %v744_v50 = vcombine.low %v97_v36, %v101_v37  ;;  %v751_v52 = vcombine.high %v104_v41, %v108_v43  ;;  %v986_v14 = vshrl.u32 %v29_v13, 7 }
  0x10   :  { %496 = vmatprep.subr.bf16.mxu0 %v735_v32  ;;  %v109_v45 = vld [vmem:[%s1130_s3 + $0x168] sm:$0xff]  ;;  %v952_v51 = vld [vmem:[%s1130_s3 + $0x38] sm:$0xff]  ;;  %v714_v53 = vcombine.low %v937_v46, %v942_v47  ;;  %v112_v56 = vld [vmem:[%s1130_s3 + $0x180] sm:$0xff]  ;;  %v750_v60 = vcombine.low %v104_v41, %v108_v43  ;;  %v715_v11 = vcombine.high %v937_v46, %v942_v47 }
  0x11   :  { %v716_v54 = vcombine.low %v947_v48, %v952_v51  ;;  %v753_v55 = vcombine.high %v105_v44, %v109_v45  ;;  %v116_v57 = vld [vmem:[%s1130_s3 + $0x1a0] sm:$0xff]  ;;  %v113_v58 = vld [vmem:[%s1130_s3 + $0x188] sm:$0xff]  ;;  %v752_v61 = vcombine.low %v105_v44, %v109_v45  ;;  %v717_v12 = vcombine.high %v947_v48, %v952_v51  ;;  %v74_v32 = vld [vmem:[%s1130_s3 + $0x50] sm:$0xff] }
  0x12   :  { %538 = vmatpush1.bf16.msra.mxu1 %v736_v39  ;;  %v117_v59 = vld [vmem:[%s1130_s3 + $0x1a8] sm:$0xff]  ;;  %v759_v62 = vcombine.high %v112_v56, %v116_v57  ;;  %v120_v0 = vld [vmem:[%s1130_s3 + $0x1c0] sm:$0xff]  ;;  %v758_v5 = vcombine.low %v112_v56, %v116_v57  ;;  %v31_v15 = vsub.s32 0, %v986_v14  ;;  %v40_v16 = vsub.s32 1, %v986_v14  ;;  %v78_v33 = vld [vmem:[%s1130_s3 + $0x70] sm:$0xff] }
  0x13   :  { %497 = vmatpush1.bf16.msra.mxu0 %v734_v38  ;;  %539 = vmatprep.subr.bf16.mxu1 %v745_v42  ;;  %v761_v63 = vcombine.high %v113_v58, %v117_v59  ;;  %v124_v1 = vld [vmem:[%s1130_s3 + $0x1e0] sm:$0xff]  ;;  %v121_v2 = vld [vmem:[%s1130_s3 + $0x1c8] sm:$0xff]  ;;  %v760_v6 = vcombine.low %v113_v58, %v117_v59  ;;  %v50_v17 = vsub.s32 2, %v986_v14  ;;  %v75_v34 = vld [vmem:[%s1130_s3 + $0x58] sm:$0xff]  ;;  %v723_v38 = vcombine.high %v74_v32, %v78_v33 }
  0x14   :  { %498 = vmatprep.subr.bf16.mxu0 %v743_v40  ;;  %v125_v4 = vld [vmem:[%s1130_s3 + $0x1e8] sm:$0xff]  ;;  %v767_v7 = vcombine.high %v120_v0, %v124_v1  ;;  %v766_v9 = vcombine.low %v120_v0, %v124_v1  ;;  %v23_v18 = vld [vmem:[%s1128_s1] sm:$0x7]  ;;  %v79_v35 = vld [vmem:[%s1130_s3 + $0x78] sm:$0xff]  ;;  %v722_v44 = vcombine.low %v74_v32, %v78_v33 }
  0x15   :  { %v769_v8 = vcombine.high %v121_v2, %v125_v4  ;;  %v768_v10 = vcombine.low %v121_v2, %v125_v4  ;;  %v32_v20 = vrot.slane %v23_v18, %v31_v15  ;;  %v41_v21 = vrot.slane %v23_v18, %v40_v16  ;;  %v709_v29 = vld [vmem:[%s1129_s2] ss:$0 sm:$0xff]  ;;  %v82_v40 = vld [vmem:[%s1130_s3 + $0x90] sm:$0xff]  ;;  %v83_v42 = vld [vmem:[%s1130_s3 + $0x98] sm:$0xff] }
  0x16   :  { %540 = vmatpush1.bf16.msra.mxu1 %v744_v50  ;;  %v51_v22 = vrot.slane %v23_v18, %v50_v17  ;;  %v725_v39 = vcombine.high %v75_v34, %v79_v35  ;;  %v86_v41 = vld [vmem:[%s1130_s3 + $0xb0] sm:$0xff]  ;;  %v87_v43 = vld [vmem:[%s1130_s3 + $0xb8] sm:$0xff]  ;;  %v724_v45 = vcombine.low %v75_v34, %v79_v35 }
  0x17   :  { %499 = vmatpush1.bf16.msra.mxu0 %v742_v49  ;;  %541 = vmatprep.subr.bf16.mxu1 %v753_v55  ;;  %v731_v49 = vcombine.high %v82_v40, %v86_v41  ;;  %v733_v50 = vcombine.high %v83_v42, %v87_v43  ;;  %v94_v55 = vld [vmem:[%s1130_s3 + $0xf0] sm:$0xff]  ;;  %v91_v46 = vld [vmem:[%s1130_s3 + $0xd8] sm:$0xff]  ;;  %v730_v48 = vcombine.low %v82_v40, %v86_v41 }
  0x18   :  { %500 = vmatprep.subr.bf16.mxu0 %v751_v52  ;;  %v90_v52 = vld [vmem:[%s1130_s3 + $0xd0] sm:$0xff]  ;;  %v95_v47 = vld [vmem:[%s1130_s3 + $0xf8] sm:$0xff]  ;;  %v732_v51 = vcombine.low %v83_v42, %v87_v43 }
  0x19   :  { %v98_v56 = vld [vmem:[%s1130_s3 + $0x110] sm:$0xff]  ;;  %v103_v58 = vld [vmem:[%s1130_s3 + $0x138] sm:$0xff]  ;;  %v738_v59 = vcombine.low %v90_v52, %v94_v55 }
  0x1a   :  { %542 = vmatpush1.bf16.msra.mxu1 %v752_v61  ;;  %v102_v57 = vld [vmem:[%s1130_s3 + $0x130] sm:$0xff]  ;;  %v107_v1 = vld [vmem:[%s1130_s3 + $0x158] sm:$0xff] }
  0x1b   :  { %501 = vmatpush1.bf16.msra.mxu0 %v750_v60  ;;  %543 = vmatprep.subr.bf16.mxu1 %v761_v63  ;;  %v740_v60 = vcombine.low %v91_v46, %v95_v47  ;;  %v747_v61 = vcombine.high %v98_v56, %v102_v57  ;;  %v106_v63 = vld [vmem:[%s1130_s3 + $0x150] sm:$0xff]  ;;  %v111_v2 = vld [vmem:[%s1130_s3 + $0x178] sm:$0xff]  ;;  %v746_v4 = vcombine.low %v98_v56, %v102_v57 }
  0x1c   :  { %502 = vmatprep.subr.bf16.mxu0 %v759_v62  ;;  %v110_v0 = vld [vmem:[%s1130_s3 + $0x170] sm:$0xff]  ;;  %v756_v13 = vcombine.low %v107_v1, %v111_v2 }
  0x1e   :  { %544 = vmatpush1.bf16.msra.mxu1 %v760_v6  ;;  %v755_v6 = vcombine.high %v106_v63, %v110_v0 }
  0x1f   :  { %503 = vmatpush1.bf16.msra.mxu0 %v758_v5  ;;  %545 = vmatprep.subr.bf16.mxu1 %v769_v8  ;;  %v114_v8 = vld [vmem:[%s1130_s3 + $0x190] sm:$0xff] }
  0x20   :  { %504 = vmatprep.subr.bf16.mxu0 %v767_v7  ;;  %v757_v7 = vcombine.high %v107_v1, %v111_v2 }
  0x22   :  { %546 = vmatpush1.bf16.msra.mxu1 %v768_v10  ;;  %v115_v10 = vld [vmem:[%s1130_s3 + $0x198] sm:$0xff] }
  0x23   :  { %505 = vmatpush1.bf16.msra.mxu0 %v766_v9  ;;  %613 = vmatprep.subr.bf16.mxu1 %v717_v12  ;;  %v118_v9 = vld [vmem:[%s1130_s3 + $0x1b0] sm:$0xff]  ;;  %v754_v12 = vcombine.low %v106_v63, %v110_v0  ;;  %v160_v63 = vsub.s32 7, %v986_v14 }
  0x24   :  { %572 = vmatprep.subr.bf16.mxu0 %v715_v11  ;;  %v119_v11 = vld [vmem:[%s1130_s3 + $0x1b8] sm:$0xff]  ;;  %v763_v18 = vcombine.high %v114_v8, %v118_v9 }
  0x81   :  { %v27_v19 = vpop.permute.xlu0 %26  ;;  %v46_v23 = vpop.permute.xlu1 %45 }
  0x82   :  { %v33_v25 = vmul.f32 %v32_v20, %v27_v19  ;;  %v52_v27 = vmul.f32 %v51_v22, %v46_v23  ;;  %v765_v19 = vcombine.high %v115_v10, %v119_v11  ;;  %v122_v20 = vld [vmem:[%s1130_s3 + $0x1d0] sm:$0xff]  ;;  %v123_v22 = vld [vmem:[%s1130_s3 + $0x1d8] sm:$0xff] }
  0x83   :  { %v127_v23 = vld [vmem:[%s1130_s3 + $0x1f8] sm:$0xff] }
  0x88   :  { %v36_v24 = vpop.permute.xlu0 %35 }
  0x89   :  { %v42_v26 = vmul.f32 %v41_v21, %v36_v24  ;;  %v126_v21 = vld [vmem:[%s1130_s3 + $0x1f0] sm:$0xff]  ;;  %v762_v24 = vcombine.low %v114_v8, %v118_v9 }
  0x8b   :  { %v43_v28 = vadd.f32 %v42_v26, %v33_v25  ;;  %v764_v25 = vcombine.low %v115_v10, %v119_v11  ;;  %v771_v26 = vcombine.high %v122_v20, %v126_v21 }
  0x8d   :  { %v53_v30 = vadd.f32 %v52_v27, %v43_v28  ;;  %v773_v27 = vcombine.high %v123_v22, %v127_v23  ;;  %v770_v28 = vcombine.low %v122_v20, %v126_v21 }
  0x8f   :  { %v61_v31 = vadd.f32 %v709_v29, %v53_v30  ;;  %v772_v29 = vcombine.low %v123_v22, %v127_v23  ;;  %v128_v30 = vld [vmem:[%s1131_s4] sm:$0xff]  ;;  %s825_s4 = smov [#allocation2]  }
  0x90   :  { %v133_v32 = vrot.slane %v128_v30, %v31_v15  ;;  %v141_v33 = vrot.slane %v128_v30, %v50_v17  ;;  %v137_v34 = vrot.slane %v128_v30, %v40_v16  ;;  %s701_s18 = sshll.u32 %s825_s4, 4  ;;  %s702_s18 = int_to_ptr.vmem [resolvable:$true] %s701_s18 }
  0x91   :  { %v62_v36 = vmax.f32 %v61_v31, 0.0  ;;  %v144_v31 = vsub.s32 3, %v986_v14  ;;  %s798_s19 = scalar_lea.vmem %s702_s18, 1024  ;;  %p803_p1 = scmp.lt.s32.totalorder %s702_s18, %s702_s18 }
  0x92   :  { %p799_p0 = scmp.ne.s32.totalorder %s702_s18, %s798_s19  ;;  %p804_p2 = scmp.lt.s32.totalorder %s798_s19, %s798_s19 }
  0x93   :  { %v1015_v37 = vpack.c.bf16 %v62_v36, %v62_v36  ;;  %v145_v35 = vrot.slane %v128_v30, %v144_v31 }
  0x94   :  { %p805_p3 = por %p804_p2, %p803_p1 }
  0x95   :  { %523 = vmatmul.mubr.bf16.vlgmr.msra.gmra.mrb[0].mxu0 %v1015_v37  ;;  %564 = vmatmul.mubr.bf16.vlgmr.msra.gmra.mrb[0].mxu1 %v1015_v37 }
  0x96   :  { %573 = vmatpush1.bf16.msra.mxu0 %v714_v53  ;;  %614 = vmatpush1.bf16.msra.mxu1 %v716_v54  ;;  %v739_v53 = vcombine.high %v90_v52, %v94_v55  ;;  %v741_v54 = vcombine.high %v91_v46, %v95_v47  ;;  %p806_p4 = pnand %p805_p3, %p799_p0 }
  0x97   :  { %574 = vmatprep.subr.bf16.mxu0 %v723_v38  ;;  %615 = vmatprep.subr.bf16.mxu1 %v725_v39 }
  0x98   :  { %604 = vmatprep.mubr.bf16.mxu0 %v822_v3  ;;  %645 = vmatprep.mubr.bf16.mxu1 %v822_v3  ;;  %v99_v3 = vld [vmem:[%s1130_s3 + $0x118] sm:$0xff] }
  0x99   :  { %v749_v62 = vcombine.high %v99_v3, %v103_v58  ;;  %v748_v5 = vcombine.low %v99_v3, %v103_v58 }
  0x9a   :  { %575 = vmatpush1.bf16.msra.mxu0 %v722_v44  ;;  %616 = vmatpush1.bf16.msra.mxu1 %v724_v45 }
  0x9b   :  { %576 = vmatprep.subr.bf16.mxu0 %v731_v49  ;;  %617 = vmatprep.subr.bf16.mxu1 %v733_v50 }
  0x9e   :  { %577 = vmatpush1.bf16.msra.mxu0 %v730_v48  ;;  %618 = vmatpush1.bf16.msra.mxu1 %v732_v51 }
  0x9f   :  { %578 = vmatprep.subr.bf16.mxu0 %v739_v53  ;;  %619 = vmatprep.subr.bf16.mxu1 %v741_v54 }
  0xa2   :  { %579 = vmatpush1.bf16.msra.mxu0 %v738_v59  ;;  %620 = vmatpush1.bf16.msra.mxu1 %v740_v60  ;;  %v148_v60 = vsub.s32 4, %v986_v14 }
  0xa3   :  { %580 = vmatprep.subr.bf16.mxu0 %v747_v61  ;;  %621 = vmatprep.subr.bf16.mxu1 %v749_v62  ;;  %v156_v61 = vsub.s32 6, %v986_v14  ;;  %v152_v62 = vsub.s32 5, %v986_v14 }
  0xa4   :  { %v149_v0 = vrot.slane %v128_v30, %v148_v60 }
  0xa5   :  { %v157_v1 = vrot.slane %v128_v30, %v156_v61  ;;  %v153_v2 = vrot.slane %v128_v30, %v152_v62 }
  0xa6   :  { %581 = vmatpush1.bf16.msra.mxu0 %v746_v4  ;;  %622 = vmatpush1.bf16.msra.mxu1 %v748_v5  ;;  %v161_v4 = vrot.slane %v128_v30, %v160_v63 }
  0xa7   :  { %582 = vmatprep.subr.bf16.mxu0 %v755_v6  ;;  %623 = vmatprep.subr.bf16.mxu1 %v757_v7 }
  0xaa   :  { %583 = vmatpush1.bf16.msra.mxu0 %v754_v12  ;;  %624 = vmatpush1.bf16.msra.mxu1 %v756_v13 }
  0xab   :  { %584 = vmatprep.subr.bf16.mxu0 %v763_v18  ;;  %625 = vmatprep.subr.bf16.mxu1 %v765_v19 }
  0xae   :  { %585 = vmatpush1.bf16.msra.mxu0 %v762_v24  ;;  %626 = vmatpush1.bf16.msra.mxu1 %v764_v25 }
  0xaf   :  { %586 = vmatprep.subr.bf16.mxu0 %v771_v26  ;;  %627 = vmatprep.subr.bf16.mxu1 %v773_v27 }
  0xb2   :  { %587 = vmatpush1.bf16.msra.mxu0 %v770_v28  ;;  %628 = vmatpush1.bf16.msra.mxu1 %v772_v29 }
  0xb5   :  { %605 = vmatmul.mubr.bf16.vlgmr.msra.gmra.mrb[4].mxu0 %v1015_v37  ;;  %646 = vmatmul.mubr.bf16.vlgmr.msra.gmra.mrb[4].mxu1 %v1015_v37 }
 0x168   :  { %v524_v36 = vpop.f32.mrb[0].mxu0  ;;  %v565_v38 = vpop.f32.mrb[0].mxu1 }
 0x169   :  { %v525_v39 = vadd.f32 %v524_v36, %v133_v32  ;;  %v566_v37 = vadd.f32 %v565_v38, %v141_v33  ;;  %v526_v40 = vpop.f32.mrb[1].mxu0  ;;  %v567_v41 = vpop.f32.mrb[1].mxu1 }
 0x16a   :  { %v527_v42 = vadd.f32 %v526_v40, %v137_v34  ;;  %v568_v43 = vadd.f32 %v567_v41, %v145_v35  ;;  %v528_v44 = vpop.f32.mrb[2].mxu0  ;;  %v569_v45 = vpop.f32.mrb[2].mxu1 }
 0x16b   :  { %v654_v49 = vmul.f32 0.5, %v525_v39  ;;  %v656_v50 = vmul.f32 0.5, %v566_v37  ;;  %v529_v15 = vpop.f32.mrb[3].mxu0  ;;  %v570_v52 = vpop.f32.mrb[3].mxu1 }
 0x16c   :  { %v655_v55 = vmul.f32 0.5, %v527_v42  ;;  %v657_v17 = vmul.f32 0.5, %v568_v43 }
 0x16d   :  { %782 = vtanh.f32 %v654_v49 }
 0x16e   :  { %784 = vtanh.f32 %v656_v50 }
 0x16f   :  { %786 = vtanh.f32 %v655_v55 }
 0x170   :  { %788 = vtanh.f32 %v657_v17 }
 0x177   :  { %v783_v16 = vpop.eup %782 }
 0x178   :  { %v785_v46 = vpop.eup %784  ;;  %v670_v47 = vmul.f32 0.5, %v783_v16 }
 0x179   :  { %v787_v48 = vpop.eup %786  ;;  %v672_v51 = vmul.f32 0.5, %v785_v46 }
 0x17a   :  { %v789_v53 = vpop.eup %788  ;;  %v678_v54 = vadd.f32 0.5, %v670_v47  ;;  %v671_v56 = vmul.f32 0.5, %v787_v48 }
 0x17b   :  { %v680_v57 = vadd.f32 0.5, %v672_v51  ;;  %v673_v3 = vmul.f32 0.5, %v789_v53 }
 0x17c   :  { %686 = vst [vmem:[#allocation2] sm:$0xff] %v678_v54  ;;  %v679_v58 = vadd.f32 0.5, %v671_v56 }
 0x17d   :  { %688 = vst [vmem:[#allocation2 + $0x10] sm:$0xff] %v680_v57  ;;  %v681_v59 = vadd.f32 0.5, %v673_v3 }
 0x17e   :  { %687 = vst [vmem:[#allocation2 + $0x8] sm:$0xff] %v679_v58 }
 0x17f   :  { %689 = vst [vmem:[#allocation2 + $0x18] sm:$0xff] %v681_v59 }
 0x188   :  { %v606_v5 = vpop.f32.mrb[4].mxu0  ;;  %v647_v6 = vpop.f32.mrb[4].mxu1 }
 0x189   :  { %v607_v7 = vadd.f32 %v606_v5, %v149_v0  ;;  %v648_v8 = vadd.f32 %v647_v6, %v157_v1  ;;  %v608_v9 = vpop.f32.mrb[5].mxu0  ;;  %v649_v10 = vpop.f32.mrb[5].mxu1 }
 0x18a   :  { %v609_v11 = vadd.f32 %v608_v9, %v153_v2  ;;  %v650_v12 = vadd.f32 %v649_v10, %v161_v4  ;;  %v610_v13 = vpop.f32.mrb[6].mxu0  ;;  %v651_v18 = vpop.f32.mrb[6].mxu1 }
 0x18b   :  { %v658_v19 = vmul.f32 0.5, %v607_v7  ;;  %v660_v20 = vmul.f32 0.5, %v648_v8  ;;  %v611_v21 = vpop.f32.mrb[7].mxu0  ;;  %v652_v22 = vpop.f32.mrb[7].mxu1 }
 0x18c   :  { %v659_v23 = vmul.f32 0.5, %v609_v11  ;;  %v661_v14 = vmul.f32 0.5, %v650_v12 }
 0x18d   :  { %790 = vtanh.f32 %v658_v19 }
 0x18e   :  { %792 = vtanh.f32 %v660_v20 }
 0x18f   :  { %794 = vtanh.f32 %v659_v23 }
 0x190   :  { %796 = vtanh.f32 %v661_v14 }
 0x197   :  { %v791_v24 = vpop.eup %790 }
 0x198   :  { %v793_v25 = vpop.eup %792  ;;  %v674_v26 = vmul.f32 0.5, %v791_v24 }
 0x199   :  { %v795_v27 = vpop.eup %794  ;;  %v676_v28 = vmul.f32 0.5, %v793_v25 }
 0x19a   :  { %v797_v29 = vpop.eup %796  ;;  %v682_v30 = vadd.f32 0.5, %v674_v26  ;;  %v675_v31 = vmul.f32 0.5, %v795_v27 }
 0x19b   :  { %v684_v32 = vadd.f32 0.5, %v676_v28  ;;  %v677_v33 = vmul.f32 0.5, %v797_v29 }
 0x19c   :  { %690 = vst [vmem:[#allocation2 + $0x20] sm:$0xff] %v682_v30  ;;  %v683_v34 = vadd.f32 0.5, %v675_v31 }
 0x19d   :  { %692 = vst [vmem:[#allocation2 + $0x30] sm:$0xff] %v684_v32  ;;  %v685_v35 = vadd.f32 0.5, %v677_v33 }
 0x19e   :  { %691 = vst [vmem:[#allocation2 + $0x28] sm:$0xff] %v683_v34 }
 0x19f   :  { %694 = vst.msk [vmem:[#allocation2 + $0x38] sm:$0xff] %vm693_vm0, %v685_v35 }
 0x1a0   :  { %809 = shalt.err (!%p806_p4)
}
 0x1a1   :  { %s810_s22 = scalar_lea.hbm %s1132_s5, 1024 }
 0x1a2   :  { %p811_p5 = scmp.ne.s32.totalorder %s1132_s5, %s810_s22  ;;  %p814_p6 = scmp.lt.u32.totalorder %s810_s22, %s1132_s5 }
 0x1a4   :  { %p816_p7 = pnand %p814_p6, %p811_p5 }
 0x1a6   :  { %819 = shalt.err (!%p816_p7)
}
 0x1a7   :  { %704 = dma.vmem_to_hbm [thread:$0]  %s702_s18, 1024, %s1132_s5, [#allocation3]  }
 0x1a8   :  { %820 = dma.done.wait [#allocation3], 1024  }
 0x1a9   :  { %821 = vsyncadd [#allocation3], 4294966272 }
 0x1aa   :  { %708 = vsyncpa [#allocation3], 1 }

</bundles_post_ra>
